<compile_context>
chip_gen: v7x
topology: tpu7x:2x2x1
jax: 0.10.0
libtpu: 0.0.40
codegen_flags: <defaults>
</compile_context>

<pallas_src>
import functools
import math

import jax
import jax.numpy as jnp
from jax import lax
from jax.experimental import pallas as pl
from jax.experimental.pallas import tpu as pltpu


# ----------------------------------------------------------------------------
# small helpers (tiling / padding)
# ----------------------------------------------------------------------------

def _round_up(x, m):
    return (x + m - 1) // m * m


def _tile_rows(m, pref=256, align=8):
    """Row (sublane) tile size and padded extent."""
    if m <= pref:
        t = _round_up(m, align)
        return t, t
    return pref, _round_up(m, pref)


def _tile_lanes(n, pref, align=128):
    """Lane tile size and padded extent (prefers a tile that divides evenly)."""
    if n <= pref:
        t = _round_up(n, align)
        return t, t
    npad = _round_up(n, align)
    c = pref
    while c >= align:
        if npad % c == 0:
            return c, npad
        c //= 2
    return pref, _round_up(n, pref)


def _pad2(x, rows, cols):
    pr, pc = rows - x.shape[0], cols - x.shape[1]
    if pr == 0 and pc == 0:
        return x
    return jnp.pad(x, ((0, pr), (0, pc)))


# ----------------------------------------------------------------------------
# Fused (LayerNorm?) -> matmul -> (+bias) -> (GELU?) -> (+residual) kernel
# ----------------------------------------------------------------------------

def _mm_kernel(*refs, nk, activation, has_ln, has_bias, has_res,
               k_valid, tk, eps):
    idx = 0
    x_ref = refs[idx]; idx += 1
    w_ref = refs[idx]; idx += 1
    if has_ln:
        g_ref = refs[idx]; b2_ref = refs[idx + 1]; idx += 2
    if has_bias:
        bias_ref = refs[idx]; idx += 1
    if has_res:
        res_ref = refs[idx]; idx += 1
    o_ref = refs[idx]; acc_ref = refs[idx + 1]

    k = pl.program_id(2)

    @pl.when(k == 0)
    def _():
        acc_ref[...] = jnp.zeros_like(acc_ref)

    x = x_ref[...]
    if has_ln:
        # LayerNorm prologue in f32 (requires single K tile; wrapper enforces).
        xf = x.astype(jnp.float32)
        if k_valid < tk:
            cols = lax.broadcasted_iota(jnp.int32, xf.shape, 1)
            valid = cols < k_valid
            xf = jnp.where(valid, xf, 0.0)
        inv_k = 1.0 / float(k_valid)
        mean = jnp.sum(xf, axis=-1, keepdims=True) * inv_k
        d = xf - mean
        if k_valid < tk:
            d = jnp.where(valid, d, 0.0)
        var = jnp.sum(d * d, axis=-1, keepdims=True) * inv_k
        y = d * lax.rsqrt(var + eps)
        y = y * g_ref[...] + b2_ref[...]      # padded gamma/beta are zero
        x = y.astype(x_ref.dtype)             # back to bf16 for the MXU

    acc_ref[...] += jnp.dot(x, w_ref[...], preferred_element_type=jnp.float32)

    @pl.when(k == nk - 1)
    def _():
        acc = acc_ref[...]
        if has_bias:
            acc = acc + bias_ref[...]
        if activation == "gelu":
            # exact (erf) GELU, matching nn.GELU(); stays in f32
            acc = 0.5 * acc * (1.0 + lax.erf(acc * (1.0 / math.sqrt(2.0))))
        if has_res:
            acc = acc + res_ref[...].astype(jnp.float32)
        o_ref[...] = acc.astype(o_ref.dtype)


def matmul(x, w, b=None, *, activation=None, residual=None, ln=None,
           ln_eps=1e-5, out_dtype=jnp.bfloat16):
    """out = act(LN?(x) @ w + b) + residual?.   x:(M,K) w:(K,N) b:(N,)."""
    M, K = x.shape
    K2, N = w.shape
    assert K == K2
    tm, Mp = _tile_rows(M, pref=256)
    tn, Np = _tile_lanes(N, pref=256)
    if ln is not None:
        tk = Kp = _round_up(K, 128)           # LN needs the whole row in VMEM
    else:
        tk, Kp = _tile_lanes(K, pref=512)
    nk = Kp // tk

    operands = [_pad2(x.astype(jnp.bfloat16), Mp, Kp),
                _pad2(w.astype(jnp.bfloat16), Kp, Np)]
    in_specs = [pl.BlockSpec((tm, tk), lambda i, j, k: (i, k)),
                pl.BlockSpec((tk, tn), lambda i, j, k: (k, j))]

    has_ln = ln is not None
    if has_ln:
        gamma, beta = ln
        operands.append(_pad2(gamma.reshape(1, K).astype(jnp.float32), 1, Kp))
        operands.append(_pad2(beta.reshape(1, K).astype(jnp.float32), 1, Kp))
        in_specs.append(pl.BlockSpec((1, tk), lambda i, j, k: (0, k)))
        in_specs.append(pl.BlockSpec((1, tk), lambda i, j, k: (0, k)))
    has_bias = b is not None
    if has_bias:
        operands.append(_pad2(b.reshape(1, N).astype(jnp.float32), 1, Np))
        in_specs.append(pl.BlockSpec((1, tn), lambda i, j, k: (0, j)))
    has_res = residual is not None
    if has_res:
        operands.append(_pad2(residual.astype(jnp.bfloat16), Mp, Np))
        in_specs.append(pl.BlockSpec((tm, tn), lambda i, j, k: (i, j)))

    kernel = functools.partial(
        _mm_kernel, nk=nk, activation=activation, has_ln=has_ln,
        has_bias=has_bias, has_res=has_res, k_valid=K, tk=tk, eps=ln_eps)

    out = pl.pallas_call(
        kernel,
        out_shape=jax.ShapeDtypeStruct((Mp, Np), out_dtype),
        grid_spec=pltpu.PrefetchScalarGridSpec(
            num_scalar_prefetch=0,
            grid=(Mp // tm, Np // tn, nk),
            in_specs=in_specs,
            out_specs=pl.BlockSpec((tm, tn), lambda i, j, k: (i, j)),
            scratch_shapes=[pltpu.VMEM((tm, tn), jnp.float32)]),
        compiler_params=pltpu.CompilerParams(
            dimension_semantics=("parallel", "parallel", "arbitrary")),
    )(*operands)
    return out[:M, :N]


# ----------------------------------------------------------------------------
# Standalone LayerNorm (only needed for vision ln_pre; gridded over rows)
# ----------------------------------------------------------------------------

def _ln_kernel(x_ref, g_ref, b_ref, o_ref, *, eps):
    x = x_ref[...].astype(jnp.float32)
    mean = jnp.mean(x, axis=-1, keepdims=True)
    d = x - mean
    var = jnp.mean(d * d, axis=-1, keepdims=True)
    y = d * lax.rsqrt(var + eps)
    o_ref[...] = (y * g_ref[...] + b_ref[...]).astype(o_ref.dtype)


def layernorm(x, gamma, beta, eps=1e-5):
    M, W = x.shape
    tm, Mp = _tile_rows(M, pref=512)
    xb = _pad2(x.astype(jnp.bfloat16), Mp, W)
    out = pl.pallas_call(
        functools.partial(_ln_kernel, eps=eps),
        out_shape=jax.ShapeDtypeStruct((Mp, W), jnp.bfloat16),
        grid_spec=pltpu.PrefetchScalarGridSpec(
            num_scalar_prefetch=0,
            grid=(Mp // tm,),
            in_specs=[pl.BlockSpec((tm, W), lambda i: (i, 0)),
                      pl.BlockSpec((1, W), lambda i: (0, 0)),
                      pl.BlockSpec((1, W), lambda i: (0, 0))],
            out_specs=pl.BlockSpec((tm, W), lambda i: (i, 0))),
        compiler_params=pltpu.CompilerParams(dimension_semantics=("parallel",)),
    )(xb, gamma.reshape(1, W).astype(jnp.float32),
      beta.reshape(1, W).astype(jnp.float32))
    return out[:M]


# ----------------------------------------------------------------------------
# Flash attention (online softmax, mask built in-kernel from iota)
# ----------------------------------------------------------------------------

def _flash_attn_kernel(q_ref, k_ref, v_ref, o_ref, m_ref, l_ref, acc_ref, *,
                       scale, causal, kv_mask, s_valid, tq, tk, n_kv):
    qi = pl.program_id(1)
    kv = pl.program_id(2)

    @pl.when(kv == 0)
    def _():
        m_ref[...] = jnp.full(m_ref.shape, -jnp.inf, jnp.float32)
        l_ref[...] = jnp.zeros_like(l_ref)
        acc_ref[...] = jnp.zeros_like(acc_ref)

    # apply the softmax scale to q (tq x Dh ops) instead of the scores (tq x tk)
    q = (q_ref[0].astype(jnp.float32) * scale).astype(jnp.bfloat16)
    s = jnp.einsum("qd,kd->qk", q, k_ref[0],
                   preferred_element_type=jnp.float32)          # (tq, tk) f32

    if causal or kv_mask:
        k_ids = kv * tk + lax.broadcasted_iota(jnp.int32, (tq, tk), 1)
        valid = None
        if causal:
            q_ids = qi * tq + lax.broadcasted_iota(jnp.int32, (tq, tk), 0)
            valid = q_ids >= k_ids
        if kv_mask:
            kvalid = k_ids < s_valid
            valid = kvalid if valid is None else jnp.logical_and(valid, kvalid)
        s = jnp.where(valid, s, -1e30)

    m_prev = m_ref[...]
    m_new = jnp.maximum(m_prev, jnp.max(s, axis=-1, keepdims=True))
    alpha = jnp.exp(m_prev - m_new)
    p = jnp.exp(s - m_new)
    l_ref[...] = alpha * l_ref[...] + jnp.sum(p, axis=-1, keepdims=True)
    acc_ref[...] = alpha * acc_ref[...] + jnp.dot(
        p.astype(jnp.bfloat16), v_ref[0], preferred_element_type=jnp.float32)
    m_ref[...] = m_new

    @pl.when(kv == n_kv - 1)
    def _():
        l = l_ref[...]
        l = jnp.where(l == 0.0, 1.0, l)          # guard fully-masked rows
        o_ref[0] = (acc_ref[...] * pl.reciprocal(l, approx=True)
                    ).astype(o_ref.dtype)


def flash_attention(q, k, v, *, causal):
    """q,k,v: (BH, S, Dh) bf16 -> (BH, S, Dh) bf16."""
    BH, S, Dh = q.shape
    scale = 1.0 / math.sqrt(Dh)
    if S <= 256:
        t = _round_up(S, 8)
        Sp = t
    else:
        t = 128
        Sp = _round_up(S, 128)
    # TODO(synk): pack 2 heads per MXU tile when head_dim=64 instead of padding
    #             Dh up to 128 (halves wasted MXU/VMEM on the PV matmul).
    Dp = _round_up(Dh, 128)

    def pad3(a):
        a = a.astype(jnp.bfloat16)
        ps, pd = Sp - S, Dp - Dh
        if ps or pd:
            a = jnp.pad(a, ((0, 0), (0, ps), (0, pd)))
        return a

    qp, kp, vp = pad3(q), pad3(k), pad3(v)
    n_q = Sp // t
    n_kv = Sp // t

    kernel = functools.partial(
        _flash_attn_kernel, scale=scale, causal=causal,
        kv_mask=(Sp != S), s_valid=S, tq=t, tk=t, n_kv=n_kv)

    out = pl.pallas_call(
        kernel,
        out_shape=jax.ShapeDtypeStruct((BH, Sp, Dp), jnp.bfloat16),
        grid_spec=pltpu.PrefetchScalarGridSpec(
            num_scalar_prefetch=0,
            grid=(BH, n_q, n_kv),
            in_specs=[
                pl.BlockSpec((1, t, Dp), lambda b, i, j: (b, i, 0)),
                pl.BlockSpec((1, t, Dp), lambda b, i, j: (b, j, 0)),
                pl.BlockSpec((1, t, Dp), lambda b, i, j: (b, j, 0)),
            ],
            out_specs=pl.BlockSpec((1, t, Dp), lambda b, i, j: (b, i, 0)),
            scratch_shapes=[
                pltpu.VMEM((t, 1), jnp.float32),   # running max
                pltpu.VMEM((t, 1), jnp.float32),   # running sum
                pltpu.VMEM((t, Dp), jnp.float32),  # output accumulator
            ]),
        compiler_params=pltpu.CompilerParams(
            dimension_semantics=("parallel", "parallel", "arbitrary")),
    )(qp, kp, vp)
    return out[:, :S, :Dh]


# ----------------------------------------------------------------------------
# L2 normalize (final features, f32)
# ----------------------------------------------------------------------------

def _l2norm_kernel(x_ref, o_ref, *, eps):
    x = x_ref[...].astype(jnp.float32)
    n = jnp.sqrt(jnp.sum(x * x, axis=-1, keepdims=True))
    o_ref[...] = x / jnp.maximum(n, eps)


def l2_normalize(x, eps=1e-12):
    return pl.pallas_call(
        functools.partial(_l2norm_kernel, eps=eps),
        out_shape=jax.ShapeDtypeStruct(x.shape, jnp.float32),
    )(x.astype(jnp.float32))


# ----------------------------------------------------------------------------
# Transformer building blocks
# ----------------------------------------------------------------------------

def residual_attention_block(x, p, heads, *, causal):
    """x: (B, S, W) bf16.  Mirrors open_clip ResidualAttentionBlock (ls=id)."""
    B, S, W = x.shape
    Dh = W // heads
    x2d = x.reshape(B * S, W)

    # --- attention branch: LN1 fused into the QKV projection ---
    qkv = matmul(x2d, p["in_w"], p["in_b"], ln=(p["ln1_g"], p["ln1_b"]))
    qkv = qkv.reshape(B, S, 3, heads, Dh)
    q = qkv[:, :, 0].transpose(0, 2, 1, 3).reshape(B * heads, S, Dh)
    k = qkv[:, :, 1].transpose(0, 2, 1, 3).reshape(B * heads, S, Dh)
    v = qkv[:, :, 2].transpose(0, 2, 1, 3).reshape(B * heads, S, Dh)
    a = flash_attention(q, k, v, causal=causal)
    a = a.reshape(B, heads, S, Dh).transpose(0, 2, 1, 3).reshape(B * S, W)
    # out-projection with the residual add fused into the epilogue
    x2d = matmul(a, p["out_w"], p["out_b"], residual=x2d)

    # --- MLP branch: LN2 + fc + exact GELU fused; residual fused into proj ---
    h = matmul(x2d, p["fc_w"], p["fc_b"], ln=(p["ln2_g"], p["ln2_b"]),
               activation="gelu")
    x2d = matmul(h, p["proj_w"], p["proj_b"], residual=x2d)
    return x2d.reshape(B, S, W)


def vision_forward(image, vp, cfg):
    """open_clip VisionTransformer forward (cls-token pooling, no attn pool)."""
    B = image.shape[0]
    ps, W = cfg["patch_size"], cfg["v_width"]
    gh = gw = cfg["image_size"] // ps
    N = gh * gw

    # patchify NCHW -> (B*N, C*p*p), flatten order (c, dy, dx)
    x = image.reshape(B, 3, gh, ps, gw, ps)
    x = x.transpose(0, 2, 4, 1, 3, 5).reshape(B * N, 3 * ps * ps)
    x = matmul(x, vp["conv_w"])                        # conv1 as matmul (no bias)
    x = x.reshape(B, N, W)

    cls = jnp.broadcast_to(vp["class_emb"].reshape(1, 1, W), (B, 1, W))
    x = jnp.concatenate([cls.astype(jnp.bfloat16), x], axis=1)   # (B, 1+N, W)
    x = x + vp["pos_emb"][None].astype(jnp.bfloat16)
    S = x.shape[1]

    x = layernorm(x.reshape(B * S, W), vp["ln_pre_g"], vp["ln_pre_b"])
    x = x.reshape(B, S, W)

    for blk in vp["blocks"]:
        x = residual_attention_block(x, blk, cfg["v_heads"], causal=False)

    pooled = x[:, 0]                                   # cls token
    # ln_post + proj fused (LN is per-token so it commutes with cls pooling)
    pooled = matmul(pooled, vp["proj"], ln=(vp["ln_post_g"], vp["ln_post_b"]),
                    out_dtype=jnp.float32)
    return pooled                                      # (B, embed_dim) f32


def text_forward(text, tp, cfg):
    """open_clip TextTransformer forward (embed_cls=False, argmax/EOT pooling)."""
    B, S = text.shape
    W = cfg["t_width"]

    x = jnp.take(tp["tok_emb"], text, axis=0)          # embedding gather (glue)
    x = x + tp["pos_emb"][:S][None].astype(jnp.bfloat16)

    for blk in tp["blocks"]:
        x = residual_attention_block(x, blk, cfg["t_heads"], causal=True)

    eot = jnp.argmax(text, axis=-1)                    # EOT = largest token id
    pooled = x[jnp.arange(B), eot]                     # (B, W)
    # ln_final + text_projection fused (LN commutes with the row gather)
    pooled = matmul(pooled, tp["text_proj"],
                    ln=(tp["ln_final_g"], tp["ln_final_b"]),
                    out_dtype=jnp.float32)
    return pooled                                      # (B, embed_dim) f32


def custom_text_clip_forward(params, image, text, cfg):
    image_features = l2_normalize(vision_forward(image, params["visual"], cfg))
    text_features = l2_normalize(text_forward(text, params["text"], cfg))
    logit_scale = jnp.exp(params["logit_scale"])
    return image_features, text_features, logit_scale


# ----------------------------------------------------------------------------
# Deterministic parameter init (weights pre-cast to bf16 once; LN/bias in f32)
# ----------------------------------------------------------------------------

def init_params(key, cfg):
    counter = [0]

    def nxt():
        counter[0] += 1
        return jax.random.fold_in(key, counter[0])

    def randn(shape, std=0.02, dtype=jnp.bfloat16):
        return (std * jax.random.normal(nxt(), shape, jnp.float32)).astype(dtype)

    def block_params(W):
        return dict(
            ln1_g=jnp.ones((W,), jnp.float32), ln1_b=jnp.zeros((W,), jnp.float32),
            in_w=randn((W, 3 * W)), in_b=jnp.zeros((3 * W,), jnp.float32),
            out_w=randn((W, W)), out_b=jnp.zeros((W,), jnp.float32),
            ln2_g=jnp.ones((W,), jnp.float32), ln2_b=jnp.zeros((W,), jnp.float32),
            fc_w=randn((W, 4 * W)), fc_b=jnp.zeros((4 * W,), jnp.float32),
            proj_w=randn((4 * W, W)), proj_b=jnp.zeros((W,), jnp.float32),
        )

    E = cfg["embed_dim"]
    Wv, Wt = cfg["v_width"], cfg["t_width"]
    ps = cfg["patch_size"]
    n_tok = (cfg["image_size"] // ps) ** 2 + 1

    visual = dict(
        conv_w=randn((3 * ps * ps, Wv)),               # conv1 as (C*p*p, width)
        class_emb=randn((Wv,)),
        pos_emb=randn((n_tok, Wv)),
        ln_pre_g=jnp.ones((Wv,), jnp.float32), ln_pre_b=jnp.zeros((Wv,), jnp.float32),
        blocks=[block_params(Wv) for _ in range(cfg["v_layers"])],
        ln_post_g=jnp.ones((Wv,), jnp.float32), ln_post_b=jnp.zeros((Wv,), jnp.float32),
        proj=randn((Wv, E)),
    )
    textp = dict(
        tok_emb=randn((cfg["vocab_size"], Wt)),
        pos_emb=randn((cfg["context_length"], Wt)),
        blocks=[block_params(Wt) for _ in range(cfg["t_layers"])],
        ln_final_g=jnp.ones((Wt,), jnp.float32), ln_final_b=jnp.zeros((Wt,), jnp.float32),
        text_proj=randn((Wt, E)),
    )
    return dict(visual=visual, text=textp,
                logit_scale=jnp.float32(math.log(1.0 / 0.07)))


# ----------------------------------------------------------------------------
# Main
# ----------------------------------------------------------------------------

if __name__ == "__main__":
    cfg = dict(
        embed_dim=32,
        # vision tower
        image_size=16, patch_size=4, v_width=32, v_layers=2, v_heads=2,
        # text tower
        context_length=8, vocab_size=64, t_width=32, t_layers=2, t_heads=2,
    )

    key = jax.random.PRNGKey(0)
    k_img, k_txt, k_par = jax.random.split(key, 3)

    image = jax.random.normal(k_img, (2, 3, 16, 16), jnp.float32)    # NCHW
    text = jax.random.randint(k_txt, (2, 8), 1, cfg["vocab_size"], jnp.int32)

    params = init_params(k_par, cfg)

    img_feat, txt_feat, logit_scale = custom_text_clip_forward(params, image, text, cfg)
    jax.block_until_ready((img_feat, txt_feat, logit_scale))

    assert img_feat.shape == (2, cfg["embed_dim"])
    assert txt_feat.shape == (2, cfg["embed_dim"])
    # features are L2-normalized
    assert jnp.allclose(jnp.linalg.norm(img_feat, axis=-1), 1.0, atol=1e-4)
    assert jnp.allclose(jnp.linalg.norm(txt_feat, axis=-1), 1.0, atol=1e-4)
    assert jnp.allclose(logit_scale, 1.0 / 0.07, rtol=1e-5)

    print("KERNEL_OK")
</pallas_src>

<mosaic_0001>
module attributes {stable_mosaic.version = 11 : i64} {
  func.func @_mm_kernel(%arg0: i32, %arg1: i32, %arg2: i32, %arg3: memref<32x128xbf16, #tpu.memory_space<vmem>>, %arg4: memref<128x128xbf16, #tpu.memory_space<vmem>>, %arg5: memref<32x128xbf16, #tpu.memory_space<vmem>>, %arg6: memref<32x128xf32, #tpu.memory_space<vmem>>) attributes {dimension_semantics = [#tpu.dimension_semantics<parallel>, #tpu.dimension_semantics<parallel>, #tpu.dimension_semantics<arbitrary>], iteration_bounds = array<i64: 1, 1, 1>, scalar_prefetch = 0 : i64, scratch_operands = 1 : i64, tpu.core_type = #tpu.core_type<tc>, window_params = [{transform_indices = @transform_0, window_bounds = array<i64: 32, 128>}, {transform_indices = @transform_1, window_bounds = array<i64: 128, 128>}, {transform_indices = @transform_2, window_bounds = array<i64: 32, 128>}]} {
    %c0_i32 = arith.constant 0 : i32
    %0 = arith.cmpi eq, %arg2, %c0_i32 : i32
    %1 = arith.extui %0 : i1 to i32
    %c0_i32_0 = arith.constant 0 : i32
    %2 = arith.cmpi ne, %1, %c0_i32_0 : i32
    scf.if %2 {
      %cst_10 = arith.constant 0.000000e+00 : f32
      %12 = vector.broadcast %cst_10 : f32 to vector<32x128xf32>
      %c0_11 = arith.constant 0 : index
      %c0_12 = arith.constant 0 : index
      %13 = vector.load %arg6[%c0_11, %c0_12] : memref<32x128xf32, #tpu.memory_space<vmem>>, vector<32x128xf32>
      tpu.vector_store %arg6[%c0_11, %c0_12], %12 {strides = array<i32>} : memref<32x128xf32, #tpu.memory_space<vmem>>, vector<32x128xf32>,
    } else {
    }
    %c0 = arith.constant 0 : index
    %c0_1 = arith.constant 0 : index
    %3 = vector.load %arg3[%c0, %c0_1] : memref<32x128xbf16, #tpu.memory_space<vmem>>, vector<32x128xbf16>
    %c0_2 = arith.constant 0 : index
    %c0_3 = arith.constant 0 : index
    %4 = vector.load %arg6[%c0_2, %c0_3] : memref<32x128xf32, #tpu.memory_space<vmem>>, vector<32x128xf32>
    %c0_4 = arith.constant 0 : index
    %c0_5 = arith.constant 0 : index
    %5 = vector.load %arg4[%c0_4, %c0_5] : memref<128x128xbf16, #tpu.memory_space<vmem>>, vector<128x128xbf16>
    %cst = arith.constant dense<0.000000e+00> : vector<32x128xf32>
    %6 = tpu.matmul %3, %5, %cst {dimension_numbers = #tpu.dot_dimension_numbers<[1], [0], [0], [1], [0, 0, 1, 1], [], []>} : vector<32x128xbf16>, vector<128x128xbf16>, vector<32x128xf32> -> vector<32x128xf32>
    %7 = arith.addf %4, %6 : vector<32x128xf32>
    %c0_6 = arith.constant 0 : index
    %c0_7 = arith.constant 0 : index
    %8 = vector.load %arg6[%c0_6, %c0_7] : memref<32x128xf32, #tpu.memory_space<vmem>>, vector<32x128xf32>
    tpu.vector_store %arg6[%c0_6, %c0_7], %7 {strides = array<i32>} : memref<32x128xf32, #tpu.memory_space<vmem>>, vector<32x128xf32>,
    %c0_i32_8 = arith.constant 0 : i32
    %9 = arith.cmpi eq, %arg2, %c0_i32_8 : i32
    %10 = arith.extui %9 : i1 to i32
    %c0_i32_9 = arith.constant 0 : i32
    %11 = arith.cmpi ne, %10, %c0_i32_9 : i32
    scf.if %11 {
      %c0_10 = arith.constant 0 : index
      %c0_11 = arith.constant 0 : index
      %12 = vector.load %arg6[%c0_10, %c0_11] : memref<32x128xf32, #tpu.memory_space<vmem>>, vector<32x128xf32>
      %13 = arith.truncf %12 : vector<32x128xf32> to vector<32x128xbf16>
      %c0_12 = arith.constant 0 : index
      %c0_13 = arith.constant 0 : index
      %14 = vector.load %arg5[%c0_12, %c0_13] : memref<32x128xbf16, #tpu.memory_space<vmem>>, vector<32x128xbf16>
      tpu.vector_store %arg5[%c0_12, %c0_13], %13 {strides = array<i32>} : memref<32x128xbf16, #tpu.memory_space<vmem>>, vector<32x128xbf16>,
    } else {
    }
    return
  }
  func.func @transform_0(%arg0: i32, %arg1: i32, %arg2: i32) -> (i32, i32) {
    %c0_i32 = arith.constant 0 : i32
    return %arg0, %arg2 : i32, i32
  }
  func.func @transform_1(%arg0: i32, %arg1: i32, %arg2: i32) -> (i32, i32) {
    %c0_i32 = arith.constant 0 : i32
    return %arg2, %arg1 : i32, i32
  }
  func.func @transform_2(%arg0: i32, %arg1: i32, %arg2: i32) -> (i32, i32) {
    %c0_i32 = arith.constant 0 : i32
    return %arg0, %arg1 : i32, i32
  }
}

</mosaic_0001>

<bundles_post_ra>
// kernel: tpu_custom_call.1
= control target key start
LH: loop header
LB: loop body
LE: loop exit
PB: predicated region body
PF: predicated region fallthrough
CT: control target
= control target key end

     0   :  { %7 = vsyncpa [#allocation4], 0  ;;  %s446_s0 = inlined_call_operand.hbm [shape: bf16[32,128], index: 0, kind: input, shape index: {}]   ;;  %s447_s1 = inlined_call_operand.hbm [shape: bf16[128,128], index: 1, kind: input, shape index: {}]   ;;  %s448_s2 = inlined_call_operand.hbm [shape: bf16[32,128], index: 2, kind: output, shape index: {}]  }
   0x1   :  { %8 = vsyncpa [#allocation7], 0 }
   0x2   :  { %9 = vsyncpa [#allocation5], 0  ;;  %s381_s9 = smov [#allocation3]   ;;  %s309_s13 = scalar_lea.hbm %s446_s0, 256 }
   0x3   :  { %s15_s10 = sshll.u32 %s381_s9, 4  ;;  %p310_p0 = scmp.ne.s32.totalorder %s446_s0, %s309_s13  ;;  %s16_s10 = int_to_ptr.vmem [resolvable:$true] %s15_s10 }
   0x4   :  { %p313_p1 = scmp.lt.u32.totalorder %s309_s13, %s446_s0 }
   0x6   :  { %p315_p2 = pnand %p313_p1, %p310_p0 }
   0x8   :  { %318 = shalt.err (!%p315_p2)
}
   0x9   :  { %s319_s18 = scalar_lea.vmem %s16_s10, 256  ;;  %p324_p4 = scmp.lt.s32.totalorder %s16_s10, %s16_s10 }
   0xa   :  { %p320_p3 = scmp.ne.s32.totalorder %s16_s10, %s319_s18  ;;  %p325_p5 = scmp.lt.s32.totalorder %s319_s18, %s319_s18 }
   0xc   :  { %p326_p6 = por %p325_p5, %p324_p4 }
   0xe   :  { %p327_p7 = pnand %p326_p6, %p320_p3 }
  0x10   :  { %330 = shalt.err (!%p327_p7)
}
  0x11   :  { %s382_s19 = smov 64   ;;  %s383_s20 = smov 4  }
  0x12   :  { %21 = dma.hbm_to_vmem [thread:$0]  %s446_s0, 256, %s16_s10, [#allocation4], %s382_s19, %s382_s19, %s383_s20  }
  0x13   :  { %s384_s23 = smov [#allocation6]   ;;  %s331_s27 = scalar_lea.hbm %s447_s1, 1024 }
  0x14   :  { %s27_s24 = sshll.u32 %s384_s23, 4  ;;  %p332_p8 = scmp.ne.s32.totalorder %s447_s1, %s331_s27  ;;  %s28_s24 = int_to_ptr.vmem [resolvable:$true] %s27_s24 }
  0x15   :  { %p335_p9 = scmp.lt.u32.totalorder %s331_s27, %s447_s1 }
  0x17   :  { %p337_p10 = pnand %p335_p9, %p332_p8 }
  0x19   :  { %340 = shalt.err (!%p337_p10)
}
  0x1a   :  { %s341_s4 = scalar_lea.vmem %s28_s24, 1024  ;;  %p346_p12 = scmp.lt.s32.totalorder %s28_s24, %s28_s24 }
  0x1b   :  { %p342_p11 = scmp.ne.s32.totalorder %s28_s24, %s341_s4  ;;  %p347_p13 = scmp.lt.s32.totalorder %s341_s4, %s341_s4 }
  0x1d   :  { %p348_p0 = por %p347_p13, %p346_p12 }
  0x1f   :  { %p349_p1 = pnand %p348_p0, %p342_p11 }
  0x21   :  { %352 = shalt.err (!%p349_p1)
}
  0x22   :  { %33 = dma.hbm_to_vmem [thread:$0]  %s447_s1, 1024, %s28_s24, [#allocation7], %s382_s19, %s382_s19, %s383_s20  }
  0x23   :  { %375 = dma.done.wait [#allocation4], 256  }
  0x24   :  { %376 = vsyncadd [#allocation4], 4294967040 }
  0x25   :  { %377 = dma.done.wait [#allocation7], 1024  }
  0x26   :  { %378 = vsyncadd [#allocation7], 4294966272  ;;  %v299_v0 = vld [vmem:[#allocation6] sm:$0xff]   ;;  %v300_v1 = vld [vmem:[#allocation6 + $0x8] sm:$0xff]   ;;  %s385_s1 = smov [#allocation8]  }
  0x27   :  { %274 = vmatprep.subr.bf16.mxu0 %v299_v0  ;;  %v301_v2 = vld [vmem:[#allocation6 + $0x10] sm:$0xff]   ;;  %v302_v3 = vld [vmem:[#allocation6 + $0x18] sm:$0xff]   ;;  %v303_v5 = vld [vmem:[#allocation6 + $0x20] sm:$0xff]   ;;  %s222_s6 = sshll.u32 %s385_s1, 4  ;;  %s223_s6 = int_to_ptr.vmem [resolvable:$true] %s222_s6 }
  0x28   :  { %275 = vmatpush3.bf16.msra.mxu0 %v299_v0  ;;  %v307_v4 = vld [vmem:[#allocation3] sm:$0xff]   ;;  %v304_v6 = vld [vmem:[#allocation6 + $0x28] sm:$0xff]   ;;  %v306_v8 = vld [vmem:[#allocation6 + $0x38] sm:$0xff]   ;;  %s353_s7 = scalar_lea.vmem %s223_s6, 256  ;;  %p358_p3 = scmp.lt.s32.totalorder %s223_s6, %s223_s6 }
  0x29   :  { %276 = vmatprep.subr.bf16.mxu0 %v300_v1  ;;  %290 = vmatprep.mubr.bf16.mxu0 %v307_v4  ;;  %v305_v7 = vld [vmem:[#allocation6 + $0x30] sm:$0xff]   ;;  %v308_v9 = vld [vmem:[#allocation3 + $0x8] sm:$0xff]   ;;  %p354_p2 = scmp.ne.s32.totalorder %s223_s6, %s353_s7  ;;  %p359_p4 = scmp.lt.s32.totalorder %s353_s7, %s353_s7 }
  0x2b   :  { %p360_p5 = por %p359_p4, %p358_p3 }
  0x2c   :  { %277 = vmatpush3.bf16.msra.mxu0 %v300_v1 }
  0x2d   :  { %278 = vmatprep.subr.bf16.mxu0 %v301_v2  ;;  %p361_p6 = pnand %p360_p5, %p354_p2 }
  0x30   :  { %279 = vmatpush3.bf16.msra.mxu0 %v301_v2 }
  0x31   :  { %280 = vmatprep.subr.bf16.mxu0 %v302_v3 }
  0x34   :  { %281 = vmatpush3.bf16.msra.mxu0 %v302_v3 }
  0x35   :  { %282 = vmatprep.subr.bf16.mxu0 %v303_v5 }
  0x38   :  { %283 = vmatpush3.bf16.msra.mxu0 %v303_v5 }
  0x39   :  { %284 = vmatprep.subr.bf16.mxu0 %v304_v6 }
  0x3c   :  { %285 = vmatpush3.bf16.msra.mxu0 %v304_v6 }
  0x3d   :  { %286 = vmatprep.subr.bf16.mxu0 %v305_v7 }
  0x40   :  { %287 = vmatpush3.bf16.msra.mxu0 %v305_v7 }
  0x41   :  { %288 = vmatprep.subr.bf16.mxu0 %v306_v8 }
  0x44   :  { %289 = vmatpush3.bf16.msra.mxu0 %v306_v8 }
  0x47   :  { %291 = vmatmul.mubr.bf16.vlgmr.msra.gmra.mrb[0].mxu0 %v308_v9 }
 0x11a   :  { %v292_v10 = vpop.f32.mrb[0].mxu0 }
 0x11b   :  { %v167_v11 = vpop.f32.mrb[1].mxu0 }
 0x11c   :  { %v293_v12 = vpop.f32.mrb[2].mxu0 }
 0x11d   :  { %v261_v13 = vpack.c.bf16 %v293_v12, %v292_v10  ;;  %v170_v14 = vpop.f32.mrb[3].mxu0 }
 0x11e   :  { %v256_v15 = vpack.c.bf16 %v170_v14, %v167_v11 }
 0x11f   :  { %263 = vst [vmem:[#allocation8 + $0x8] sm:$0xff] %v261_v13  }
 0x120   :  { %257 = vst [vmem:[#allocation8] sm:$0xff] %v256_v15  }
 0x121   :  { %364 = shalt.err (!%p361_p6)
}
 0x122   :  { %s365_s10 = scalar_lea.hbm %s448_s2, 256 }
 0x123   :  { %p366_p7 = scmp.ne.s32.totalorder %s448_s2, %s365_s10  ;;  %p369_p8 = scmp.lt.u32.totalorder %s365_s10, %s448_s2 }
 0x125   :  { %p371_p9 = pnand %p369_p8, %p366_p7 }
 0x127   :  { %374 = shalt.err (!%p371_p9)
}
 0x128   :  { %228 = dma.vmem_to_hbm [thread:$0]  %s223_s6, 256, %s448_s2, [#allocation5], %s382_s19, %s382_s19, %s383_s20  }
 0x129   :  { %379 = dma.done.wait [#allocation5], 256  }
 0x12a   :  { %380 = vsyncadd [#allocation5], 4294967040 }
 0x12b   :  { %232 = vsyncpa [#allocation4], 1 }
 0x12c   :  { %233 = vsyncpa [#allocation7], 1 }
 0x12d   :  { %234 = vsyncpa [#allocation5], 1 }

</bundles_post_ra>
